<compile_context>
chip_gen: v7x
topology: tpu7x:2x2x1
jax: 0.10.0
libtpu: 0.0.40
codegen_flags: <defaults>
</compile_context>

<pallas_src>
import functools

import jax
import jax.numpy as jnp
from jax.experimental import pallas as pl
from jax.experimental.pallas import tpu as pltpu


# ----------------------------------------------------------------------------
# In-kernel helpers
# ----------------------------------------------------------------------------
def _softmax_max_minus(energy):
    """softmax(rowmax(energy) - energy, axis=-1), numerically stable.

    softmax is shift-invariant per row, so softmax(rowmax - energy) ==
    softmax(-energy); the stable form is exp(rowmin - energy) / sum(...)
    (every exponent <= 0).  The reciprocal runs on the EUP slot.
    """
    row_min = jnp.min(energy, axis=-1, keepdims=True)
    e = jnp.exp(row_min - energy)
    denom = jnp.sum(e, axis=-1, keepdims=True)
    return e * pl.reciprocal(denom, approx=True)


def _cam_kernel_resident(gamma_ref, x_ref, out_ref, *, mm_dtype):
    """Single-pass kernel: the whole (bb, C, HWp) slab is VMEM resident."""
    x = x_ref[...]                                            # (bb, C, HWp)
    xm = x if x.dtype == mm_dtype else x.astype(mm_dtype)

    # energy = X @ X^T; contraction over the trailing HW axis of BOTH operands
    # (dot_general form), so no transposed copy of the big (C, HW) tile is made.
    energy = jnp.einsum("bcn,bdn->bcd", xm, xm,
                        preferred_element_type=jnp.float32)   # (bb, C, C) f32
    attn = _softmax_max_minus(energy)
    # Fold gamma into the small (C, C) attention matrix instead of scaling the
    # large (C, HW) matmul result in the epilogue.
    attn = (attn * gamma_ref[0]).astype(mm_dtype)

    out = jnp.einsum("bcd,bdn->bcn", attn, xm,
                     preferred_element_type=jnp.float32)      # (bb, C, HWp) f32
    out_ref[...] = (out + x.astype(jnp.float32)).astype(out_ref.dtype)


def _cam_kernel_tiled(gamma_ref, x_ref, *rest, mm_dtype, row_blocked):
    """Two-pass, HW-tiled (and optionally C-row-tiled) kernel.

    grid = (batch blocks, C-row blocks, 2 passes, HW tiles):
      pass 0:          energy_acc[rows] += X[rows] @ X^T     (f32 VMEM scratch)
      pass 1 @ t == 0: attn = gamma * softmax(rowmax - energy)  (matmul dtype)
      pass 1:          out[rows, tile] = attn[rows] @ X[:, tile] + X[rows, tile]
    """
    if row_blocked:
        xr_ref, out_ref, energy_acc, attn_vmem = rest
    else:
        out_ref, energy_acc, attn_vmem = rest
        xr_ref = x_ref

    p = pl.program_id(2)
    t = pl.program_id(3)

    @pl.when(jnp.logical_and(p == 0, t == 0))
    def _init():
        energy_acc[...] = jnp.zeros_like(energy_acc)

    @pl.when(p == 0)
    def _accumulate():
        x_all = x_ref[...]
        x_all = x_all if x_all.dtype == mm_dtype else x_all.astype(mm_dtype)
        if row_blocked:
            x_rows = xr_ref[...]
            x_rows = x_rows if x_rows.dtype == mm_dtype else x_rows.astype(mm_dtype)
        else:
            x_rows = x_all
        energy_acc[...] += jnp.einsum("bcn,bdn->bcd", x_rows, x_all,
                                      preferred_element_type=jnp.float32)

    @pl.when(jnp.logical_and(p == 1, t == 0))
    def _softmax():
        # TODO(synk): chunk this softmax over C-row slabs and interleave it with
        # the first pass-1 matmul so the EUP/VPU work hides under the MXU.
        attn = _softmax_max_minus(energy_acc[...])
        attn_vmem[...] = (attn * gamma_ref[0]).astype(attn_vmem.dtype)

    @pl.when(p == 1)
    def _write_out():
        x_all = x_ref[...]
        x_all_m = x_all if x_all.dtype == mm_dtype else x_all.astype(mm_dtype)
        out = jnp.einsum("bcd,bdn->bcn", attn_vmem[...], x_all_m,
                         preferred_element_type=jnp.float32)
        x_rows = xr_ref[...] if row_blocked else x_all
        out_ref[...] = (out + x_rows.astype(jnp.float32)).astype(out_ref.dtype)


# ----------------------------------------------------------------------------
# VMEM budgeting helpers (generation aware)
# ----------------------------------------------------------------------------
_FALLBACK_VMEM_BYTES = 64 * 1024 * 1024   # conservative if the query fails


def _vmem_capacity_bytes():
    try:
        cap = int(getattr(pltpu.get_tpu_info(), "vmem_capacity_bytes", 0))
    except Exception:
        cap = 0
    return cap if cap > 0 else _FALLBACK_VMEM_BYTES


def _divisors_desc(n):
    return [d for d in range(n, 0, -1) if n % d == 0]


def _resident_vmem_bytes(bb, C, HWp, itemsize, mm_itemsize):
    slab = bb * C * HWp
    cc = bb * C * C
    est = 2 * slab * itemsize        # double-buffered input slab
    est += 2 * slab * itemsize       # double-buffered output slab
    est += slab * mm_itemsize        # matmul-dtype copy of x
    est += slab * 4                  # f32 result of attention @ X
    est += 3 * cc * 4                # energy + softmax temporaries (f32)
    est += cc * mm_itemsize          # gamma-folded attention
    return est


def _tiled_vmem_bytes(bb, C, c_block, hw_tile, itemsize, mm_itemsize):
    x_tile = bb * C * hw_tile
    o_tile = bb * c_block * hw_tile
    cc = bb * c_block * C
    est = 2 * x_tile * itemsize      # double-buffered full-C input tile
    est += 2 * o_tile * itemsize     # double-buffered row-block input tile
    est += 2 * o_tile * itemsize     # double-buffered output tile
    est += x_tile * mm_itemsize      # matmul-dtype copy of the x tile
    est += o_tile * 4                # f32 result of attention @ X tile
    est += cc * 4                    # energy accumulator scratch (f32)
    est += cc * mm_itemsize          # attention scratch (matmul dtype)
    est += 2 * cc * 4                # softmax temporaries (f32)
    return est


def _pick_c_block(C, fits):
    """Largest row block (== C, or a multiple of 32 dividing C) that fits."""
    cands = [d for d in _divisors_desc(C) if d == C or d % 32 == 0]
    for d in cands:
        if fits(d):
            return d
    return cands[-1]                 # best effort: smallest legal row block


def _pick_hw_tile(HWp, fits):
    """Largest multiple-of-128 divisor of HWp that fits, preferring 256-multiples."""
    cands = [d for d in range(128, HWp + 1, 128) if HWp % d == 0 and fits(d)]
    if not cands:
        return 128
    best = max(cands)
    # v6e/v7x MXUs are 2x256^2: prefer a 256-multiple contraction chunk of
    # comparable size (v5e's 4x128^2 is fine either way).
    best256 = max([d for d in cands if d % 256 == 0], default=None)
    if best256 is not None and 2 * best256 >= best:
        return best256
    return best


# ----------------------------------------------------------------------------
# Wrapper
# ----------------------------------------------------------------------------
def cam_module_forward(x_nchw, gamma, *, matmul_dtype="auto", block_b=None,
                       hw_tile=None, vmem_budget_bytes=None):
    """CAM_Module.forward.  x_nchw: (B, C, H, W); gamma: the (1,) parameter.

    matmul_dtype: "auto" (bf16 MXU inputs for f32 activations; f32 accumulation
    and f32 softmax) or an explicit dtype (jnp.float32 for exact matmuls).
    """
    B, C, H, W = x_nchw.shape
    HW = H * W
    dtype = x_nchw.dtype
    itemsize = jnp.dtype(dtype).itemsize

    if matmul_dtype is None or matmul_dtype == "auto":
        mm_dtype = jnp.dtype(jnp.bfloat16) if dtype == jnp.float32 else jnp.dtype(dtype)
    else:
        mm_dtype = jnp.dtype(matmul_dtype)
    mm_itemsize = mm_dtype.itemsize

    # Generation-aware VMEM budget (v5e/v6e: 128 MiB physical, v7x: 64 MiB).
    vmem_cap = _vmem_capacity_bytes()
    vmem_limit = int(0.85 * vmem_cap)
    budget = int(vmem_budget_bytes) if vmem_budget_bytes is not None else int(0.70 * vmem_cap)

    # Lane-dense last dim: zero-pad HW to a multiple of 128 (zero columns do not
    # change X @ X^T and are sliced off afterwards).
    HWp = ((HW + 127) // 128) * 128
    x_flat = x_nchw.reshape(B, C, HW)
    if HWp != HW:
        x_flat = jnp.pad(x_flat, ((0, 0), (0, 0), (0, HWp - HW)))
    gamma = jnp.asarray(gamma, dtype=jnp.float32).reshape((1,))

    gamma_spec = pl.BlockSpec(memory_space=pltpu.MemorySpace.SMEM)
    forced_tiled = hw_tile is not None
    if block_b is not None:
        assert B % block_b == 0, "block_b must divide the batch size"

    def resident_fits(bb_):
        return _resident_vmem_bytes(bb_, C, HWp, itemsize, mm_itemsize) <= budget

    resident_bb = None
    if not forced_tiled:
        if block_b is not None:
            resident_bb = block_b if resident_fits(block_b) else None
        else:
            resident_bb = next((d for d in _divisors_desc(B) if resident_fits(d)), None)

    if resident_bb is not None:
        # ------------------------- single-pass resident path -------------------
        bb = resident_bb
        nb = B // bb
        grid_spec = pltpu.PrefetchScalarGridSpec(
            num_scalar_prefetch=0,
            grid=(nb,),
            in_specs=[gamma_spec,
                      pl.BlockSpec((bb, C, HWp), lambda b: (b, 0, 0))],
            out_specs=pl.BlockSpec((bb, C, HWp), lambda b: (b, 0, 0)),
        )
        kernel = functools.partial(_cam_kernel_resident, mm_dtype=mm_dtype)
        dim_sems = ("parallel",)
        operands = (gamma, x_flat)
        alias_ok = True
    else:
        # ------------------------- two-pass HW-tiled path ----------------------
        c_min = 32 if C % 32 == 0 else C
        if block_b is not None:
            bb = block_b
        else:
            bb = next((d for d in _divisors_desc(B)
                       if _tiled_vmem_bytes(d, C, c_min, 128, itemsize,
                                            mm_itemsize) <= budget), 1)
        nb = B // bb

        ht0 = hw_tile if hw_tile is not None else 128
        c_block = _pick_c_block(
            C, lambda cb: _tiled_vmem_bytes(bb, C, cb, ht0, itemsize,
                                            mm_itemsize) <= budget)
        if hw_tile is None:
            hw_tile = _pick_hw_tile(
                HWp, lambda ht: _tiled_vmem_bytes(bb, C, c_block, ht, itemsize,
                                                  mm_itemsize) <= budget)
        assert hw_tile % 128 == 0 and HWp % hw_tile == 0, \
            "hw_tile must be a multiple of 128 dividing the padded HW"
        ncb = C // c_block
        nt = HWp // hw_tile
        row_blocked = ncb > 1
        # TODO(synk): on v7x with nb * ncb == 1 (single-image inference), force
        # ncb = 2 so both TensorCores get a row block even when VMEM allows 1.

        in_specs = [
            gamma_spec,
            # TODO(synk): try pipeline_mode=pl.Buffered(3) here on v6e if the
            # pass-0 DMAs are still exposed.
            pl.BlockSpec((bb, C, hw_tile), lambda b, cb, p, t: (b, 0, t)),
        ]
        operands = [gamma, x_flat]
        if row_blocked:
            # The C-row block of x arrives through its own BlockSpec so the
            # kernel never does dynamic sublane slicing.
            in_specs.append(pl.BlockSpec((bb, c_block, hw_tile),
                                         lambda b, cb, p, t: (b, cb, t)))
            operands.append(x_flat)
        operands = tuple(operands)

        grid_spec = pltpu.PrefetchScalarGridSpec(
            num_scalar_prefetch=0,
            grid=(nb, ncb, 2, nt),            # (batch, C rows, pass, HW tiles)
            in_specs=in_specs,
            # Output tiles are only produced during pass 1; pinning the HW block
            # index at 0 while p == 0 (t * p == 0) means an output block's index
            # never changes before its pass-1 write, so Pallas never writes an
            # untouched VMEM buffer back to HBM.
            out_specs=pl.BlockSpec((bb, c_block, hw_tile),
                                   lambda b, cb, p, t: (b, cb, t * p)),
            scratch_shapes=[
                pltpu.VMEM((bb, c_block, C), jnp.float32),   # energy rows (f32)
                pltpu.VMEM((bb, c_block, C), mm_dtype),      # gamma * attention
            ],
        )
        kernel = functools.partial(_cam_kernel_tiled, mm_dtype=mm_dtype,
                                   row_blocked=row_blocked)
        dim_sems = ("parallel", "parallel", "arbitrary", "arbitrary")
        # With row blocking, later row blocks re-read x rows that earlier row
        # blocks already overwrote if the output aliases the input -> no alias.
        alias_ok = not row_blocked

    out_flat = pl.pallas_call(
        kernel,
        out_shape=jax.ShapeDtypeStruct((B, C, HWp), dtype),
        grid_spec=grid_spec,
        input_output_aliases={1: 0} if alias_ok else {},
        compiler_params=pltpu.CompilerParams(
            dimension_semantics=dim_sems,
            vmem_limit_bytes=vmem_limit,
        ),
    )(*operands)

    return out_flat[:, :, :HW].reshape(B, C, H, W)


# ----------------------------------------------------------------------------
# Pure-JAX reference matching the PyTorch forward
# ----------------------------------------------------------------------------
def _reference(x, gamma, matmul_dtype=None):
    B, C, H, W = x.shape
    q = x.reshape(B, C, -1)
    qm = q if matmul_dtype is None else q.astype(matmul_dtype)
    energy = jnp.einsum("bcn,bdn->bcd", qm, qm, preferred_element_type=jnp.float32)
    energy_new = jnp.max(energy, axis=-1, keepdims=True) - energy
    attention = jax.nn.softmax(energy_new, axis=-1)
    am = attention if matmul_dtype is None else attention.astype(matmul_dtype)
    out = jnp.einsum("bcd,bdn->bcn", am, qm, preferred_element_type=jnp.float32)
    out = out.reshape(B, C, H, W)
    return gamma[0] * out + x


if __name__ == "__main__":
    key = jax.random.PRNGKey(0)
    k1, k2, k3 = jax.random.split(key, 3)

    # Shapes consistent with the module: B=2, C=4, 16x16 spatial.
    x = jax.random.normal(k1, (2, 4, 16, 16), dtype=jnp.float32)
    gamma_zero = jnp.zeros((1,), dtype=jnp.float32)   # the __init__ value
    gamma_half = jnp.array([0.5], dtype=jnp.float32)

    # 1) gamma = 0 (initial parameter): out must equal x (default bf16 path).
    out0 = jax.block_until_ready(cam_module_forward(x, gamma_zero))
    assert jnp.allclose(out0, x, atol=1e-6), "gamma=0 residual path mismatch"

    # 2) resident path with exact f32 matmuls vs f32 reference.
    out1 = jax.block_until_ready(
        cam_module_forward(x, gamma_half, matmul_dtype=jnp.float32))
    ref_f32 = _reference(x, gamma_half, matmul_dtype=jnp.float32)
    assert jnp.allclose(out1, ref_f32, atol=1e-2, rtol=1e-2), "f32 resident mismatch"

    # 3) default path (bf16 MXU inputs, f32 accumulation/softmax) vs bf16 reference.
    out2 = jax.block_until_ready(cam_module_forward(x, gamma_half))
    ref_bf16 = _reference(x, gamma_half, matmul_dtype=jnp.bfloat16)
    assert jnp.allclose(out2, ref_bf16, atol=3e-2, rtol=3e-2), "bf16 resident mismatch"

    # 4) two-pass HW-tiled path (forced small tile so that path is exercised).
    out3 = jax.block_until_ready(
        cam_module_forward(x, gamma_half, hw_tile=128, block_b=1))
    assert jnp.allclose(out3, ref_bf16, atol=3e-2, rtol=3e-2), "tiled kernel mismatch"

    # 5) spatial size not a multiple of 128 exercises the lane-dense padding.
    x_odd = jax.random.normal(k2, (2, 4, 12, 12), dtype=jnp.float32)
    gamma_03 = jnp.array([0.3], dtype=jnp.float32)
    out4 = jax.block_until_ready(cam_module_forward(x_odd, gamma_03))
    ref4 = _reference(x_odd, gamma_03, matmul_dtype=jnp.bfloat16)
    assert jnp.allclose(out4, ref4, atol=3e-2, rtol=3e-2), "padded-HW mismatch"

    # 6) tiled path with C-row blocking, forced via a tiny VMEM budget.
    x_big = jax.random.normal(k3, (1, 64, 32, 32), dtype=jnp.float32)
    out5 = jax.block_until_ready(
        cam_module_forward(x_big, gamma_half, vmem_budget_bytes=200_000))
    ref5 = _reference(x_big, gamma_half, matmul_dtype=jnp.bfloat16)
    assert jnp.allclose(out5, ref5, atol=3e-2, rtol=3e-2), "C-row-tiled mismatch"

    print("KERNEL_OK")
</pallas_src>

<mosaic_0001>
module attributes {stable_mosaic.version = 11 : i64} {
  func.func @_cam_kernel_resident(%arg0: i32, %arg1: memref<1xf32, #tpu.memory_space<smem>>, %arg2: memref<2x4x256xf32, #tpu.memory_space<vmem>>, %arg3: memref<2x4x256xf32, #tpu.memory_space<vmem>>) attributes {dimension_semantics = [#tpu.dimension_semantics<parallel>], iteration_bounds = array<i64: 1>, scalar_prefetch = 0 : i64, scratch_operands = 0 : i64, tpu.core_type = #tpu.core_type<tc>, window_params = [{transform_indices = @transform_0, window_bounds = array<i64: 1>}, {transform_indices = @transform_1, window_bounds = array<i64: 2, 4, 256>}, {transform_indices = @transform_2, window_bounds = array<i64: 2, 4, 256>}]} {
    %c0 = arith.constant 0 : index
    %c0_0 = arith.constant 0 : index
    %c0_1 = arith.constant 0 : index
    %0 = vector.load %arg2[%c0, %c0_0, %c0_1] : memref<2x4x256xf32, #tpu.memory_space<vmem>>, vector<2x4x256xf32>
    %1 = arith.truncf %0 : vector<2x4x256xf32> to vector<2x4x256xbf16>
    "tpu.trace_start"() <{level = 10 : i32, message = "bcn,bdn->bcd"}> : () -> ()
    %cst = arith.constant dense<0.000000e+00> : vector<2x4x4xf32>
    %2 = tpu.matmul %1, %1, %cst {dimension_numbers = #tpu.dot_dimension_numbers<[2], [2], [1], [1], [0, 0, 0, 1, 1, 1], [0], [0]>} : vector<2x4x256xbf16>, vector<2x4x256xbf16>, vector<2x4x4xf32> -> vector<2x4x4xf32>
    "tpu.trace_stop"() : () -> ()
    %cst_2 = arith.constant dense<0x7F800000> : vector<2x4xf32>
    %3 = vector.multi_reduction <minimumf>, %2, %cst_2 [2] : vector<2x4x4xf32> to vector<2x4xf32>
    %4 = vector.shape_cast %3 : vector<2x4xf32> to vector<2x4x1xf32>
    %5 = vector.broadcast %4 : vector<2x4x1xf32> to vector<2x4x4xf32>
    %6 = arith.subf %5, %2 : vector<2x4x4xf32>
    %7 = math.exp %6 : vector<2x4x4xf32>
    %cst_3 = arith.constant dense<0.000000e+00> : vector<2x4xf32>
    %8 = vector.multi_reduction <add>, %7, %cst_3 [2] : vector<2x4x4xf32> to vector<2x4xf32>
    %9 = vector.shape_cast %8 : vector<2x4xf32> to vector<2x4x1xf32>
    %10 = tpu.reciprocal %9 {approx = true} : vector<2x4x1xf32> -> vector<2x4x1xf32>
    %11 = vector.broadcast %10 : vector<2x4x1xf32> to vector<2x4x4xf32>
    %12 = arith.mulf %7, %11 : vector<2x4x4xf32>
    %c0_4 = arith.constant 0 : index
    %13 = memref.load %arg1[%c0_4] : memref<1xf32, #tpu.memory_space<smem>>
    %14 = vector.broadcast %13 : f32 to vector<2x4x4xf32>
    %15 = arith.mulf %12, %14 : vector<2x4x4xf32>
    %16 = arith.truncf %15 : vector<2x4x4xf32> to vector<2x4x4xbf16>
    "tpu.trace_start"() <{level = 10 : i32, message = "bcd,bdn->bcn"}> : () -> ()
    %cst_5 = arith.constant dense<0.000000e+00> : vector<2x4x256xf32>
    %17 = tpu.matmul %16, %1, %cst_5 {dimension_numbers = #tpu.dot_dimension_numbers<[2], [1], [1], [2], [0, 0, 0, 1, 1, 2], [0], [0]>} : vector<2x4x4xbf16>, vector<2x4x256xbf16>, vector<2x4x256xf32> -> vector<2x4x256xf32>
    "tpu.trace_stop"() : () -> ()
    %18 = arith.addf %17, %0 : vector<2x4x256xf32>
    %c0_6 = arith.constant 0 : index
    %c0_7 = arith.constant 0 : index
    %c0_8 = arith.constant 0 : index
    %19 = vector.load %arg3[%c0_6, %c0_7, %c0_8] : memref<2x4x256xf32, #tpu.memory_space<vmem>>, vector<2x4x256xf32>
    tpu.vector_store %arg3[%c0_6, %c0_7, %c0_8], %18 {strides = array<i32>} : memref<2x4x256xf32, #tpu.memory_space<vmem>>, vector<2x4x256xf32>,
    return
  }
  func.func @transform_0(%arg0: i32) -> i32 {
    %c0_i32 = arith.constant 0 : i32
    %c0_i32_0 = arith.constant 0 : i32
    return %c0_i32 : i32
  }
  func.func @transform_1(%arg0: i32) -> (i32, i32, i32) {
    %c0_i32 = arith.constant 0 : i32
    %c0_i32_0 = arith.constant 0 : i32
    %c0_i32_1 = arith.constant 0 : i32
    return %arg0, %c0_i32, %c0_i32_0 : i32, i32, i32
  }
  func.func @transform_2(%arg0: i32) -> (i32, i32, i32) {
    %c0_i32 = arith.constant 0 : i32
    %c0_i32_0 = arith.constant 0 : i32
    %c0_i32_1 = arith.constant 0 : i32
    return %arg0, %c0_i32, %c0_i32_0 : i32, i32, i32
  }
}

</mosaic_0001>

<bundles_post_ra>
// kernel: tpu_custom_call.1
= control target key start
LH: loop header
LB: loop body
LE: loop exit
PB: predicated region body
PF: predicated region fallthrough
CT: control target
= control target key end

     0   :  { %8 = vsyncpa [#allocation4], 0  ;;  %s426_s0 = inlined_call_operand.<no memory space> [shape: f32[1], index: 0, kind: input, shape index: {}]   ;;  %s427_s1 = inlined_call_operand.hbm [shape: f32[2,4,256], index: 1, kind: input, shape index: {}, may-alias: {1,2}]   ;;  %s428_s2 = inlined_call_operand.hbm [shape: f32[2,4,256], index: 2, kind: output, shape index: {}, may-alias: {1,2}]  }
   0x1   :  { %9 = vsyncpa [#allocation5], 0  ;;  %s345_s9 = smov [#allocation3]   ;;  %s297_s13 = scalar_lea.hbm %s427_s1, 256 }
   0x2   :  { %s17_s10 = sshll.u32 %s345_s9, 4  ;;  %p298_p0 = scmp.ne.s32.totalorder %s427_s1, %s297_s13  ;;  %s18_s10 = int_to_ptr.vmem [resolvable:$true] %s17_s10 }
   0x3   :  { %p301_p1 = scmp.lt.u32.totalorder %s297_s13, %s427_s1 }
   0x5   :  { %p303_p2 = pnand %p301_p1, %p298_p0 }
   0x7   :  { %306 = shalt.err (!%p303_p2)
}
   0x8   :  { %s307_s18 = scalar_lea.vmem %s18_s10, 256  ;;  %p312_p4 = scmp.lt.s32.totalorder %s18_s10, %s18_s10 }
   0x9   :  { %p308_p3 = scmp.ne.s32.totalorder %s18_s10, %s307_s18  ;;  %p313_p5 = scmp.lt.s32.totalorder %s307_s18, %s307_s18 }
   0xb   :  { %p314_p6 = por %p313_p5, %p312_p4 }
   0xd   :  { %p315_p7 = pnand %p314_p6, %p308_p3 }
   0xf   :  { %318 = shalt.err (!%p315_p7)
}
  0x10   :  { %s346_s19 = smov 128   ;;  %s347_s20 = smov 8  }
  0x11   :  { %23 = dma.hbm_to_vmem [thread:$0]  %s427_s1, 256, %s18_s10, [#allocation4], %s346_s19, %s346_s19, %s347_s20  }
  0x12   :  { %341 = dma.done.wait [#allocation4], 256  }
  0x13   :  { %342 = vsyncadd [#allocation4], 4294967040  ;;  %v380_v0 = vld [vmem:[#allocation3] sm:$0xff]  ;;  %v382_v1 = vld [vmem:[#allocation3 + $0x8] sm:$0xff]  ;;  %vm120_vm0 = vcmask 27648   ;;  %vm153_vm1 = vcmask 1041408   ;;  %v144_v34 = vstv %s426_s0 }
  0x14   :  { %v386_v2 = vcombine.high %v380_v0, %v380_v0  ;;  %v390_v3 = vcombine.high %v382_v1, %v382_v1  ;;  %v36_v4 = vpack.c.bf16 %v380_v0, %v380_v0  ;;  %v38_v5 = vpack.c.bf16 %v382_v1, %v382_v1  ;;  %s349_s0 = smov [#allocation6]  }
  0x15   :  { %v348_v30 = vmov 0   ;;  %vm149_vm2 = vcmask 31744   ;;  %s266_s24 = sshll.u32 %s349_s0, 4  ;;  %s267_s24 = int_to_ptr.vmem [resolvable:$true] %s266_s24 }
  0x16   :  { %v37_v6 = vpack.c.bf16 %v386_v2, %v386_v2  ;;  %v39_v7 = vpack.c.bf16 %v390_v3, %v390_v3  ;;  %v155_v28 = vsel %vm153_vm1, %v36_v4, 0  ;;  %v205_v29 = vsel %vm153_vm1, %v38_v5, 0  ;;  %s319_s25 = scalar_lea.vmem %s267_s24, 256  ;;  %p324_p9 = scmp.lt.s32.totalorder %s267_s24, %s267_s24 }
  0x17   :  { %p320_p8 = scmp.ne.s32.totalorder %s267_s24, %s319_s25  ;;  %p325_p10 = scmp.lt.s32.totalorder %s319_s25, %s319_s25 }
  0x18   :  { %40 = vmatprep.subr.bf16.mxu0 %v37_v6  ;;  %80 = vmatprep.subr.bf16.mxu1 %v39_v7 }
  0x19   :  { %41 = vmatpush1.bf16.xpose.msra.mxu0 %v36_v4  ;;  %81 = vmatpush1.bf16.xpose.msra.mxu1 %v38_v5  ;;  %p326_p11 = por %p325_p10, %p324_p9 }
  0x1a   :  { %72 = vmatprep.mubr.bf16.mxu0 %v37_v6  ;;  %112 = vmatprep.mubr.bf16.mxu1 %v39_v7 }
  0x1b   :  { %278 = vmatprep.subr.msk.bf16.mxu0 %vm153_vm1, %v37_v6  ;;  %280 = vmatprep.subr.msk.bf16.mxu1 %vm153_vm1, %v39_v7  ;;  %p327_p12 = pnand %p326_p11, %p320_p8 }
  0x20   :  { %73 = vmatmul.mubr.bf16.vlgmr.msra.gmra.mrb[0].mxu0 %v36_v4  ;;  %113 = vmatmul.mubr.bf16.vlgmr.msra.gmra.mrb[0].mxu1 %v38_v5 }
  0x21   :  { %161 = vmatpush1.bf16.msra.mxu0 %v155_v28  ;;  %211 = vmatpush1.bf16.msra.mxu1 %v205_v29 }
  0x22   :  { %192 = vmatprep.mubr.bf16.mxu0 %v348_v30  ;;  %242 = vmatprep.mubr.bf16.mxu1 %v348_v30 }
  0xf3   :  { %v74_v8 = vpop.f32.mrb[0].mxu0  ;;  %v114_v9 = vpop.f32.mrb[0].mxu1 }
  0xf4   :  { %v76_v10 = vpop.f32.mrb[1].mxu0  ;;  %v116_v11 = vpop.f32.mrb[1].mxu1  ;;  %v121_v12 = vsel %vm120_vm0, %v74_v8, inf  ;;  %v124_v17 = vsel %vm120_vm0, %v114_v9, inf }
  0xf5   :  { %122 = vmin.xlane.f32.xlu0 %v121_v12  ;;  %v77_v13 = vpop.f32.mrb[2].mxu0  ;;  %v117_v14 = vpop.f32.mrb[2].mxu1 }
  0xf6   :  { %v78_v15 = vpop.f32.mrb[3].mxu0  ;;  %v118_v16 = vpop.f32.mrb[3].mxu1 }
  0xf9   :  { %125 = vmin.xlane.f32.xlu0 %v124_v17 }
 0x182   :  { %v123_v18 = vpop.xlane.xlu0 %122 }
 0x183   :  { %v127_v19 = vsub.f32 %v123_v18, %v74_v8 }
 0x185   :  { %v129_v20 = vmul.f32 1.442695, %v127_v19 }
 0x186   :  { %v126_v21 = vpop.xlane.xlu0 %125 }
 0x187   :  { %289 = vpow2.f32 %v129_v20  ;;  %v128_v22 = vsub.f32 %v126_v21, %v114_v9 }
 0x189   :  { %v131_v23 = vmul.f32 1.442695, %v128_v22 }
 0x18b   :  { %291 = vpow2.f32 %v131_v23 }
 0x191   :  { %v290_v24 = vpop.eup %289 }
 0x192   :  { %v133_v25 = vsel %vm120_vm0, %v290_v24, 0.0 }
 0x193   :  { %134 = vadd.xlane.f32.xlu1 %v133_v25 }
 0x195   :  { %v292_v26 = vpop.eup %291 }
 0x196   :  { %v136_v27 = vsel %vm120_vm0, %v292_v26, 0.0 }
 0x197   :  { %137 = vadd.xlane.f32.xlu1 %v136_v27 }
 0x220   :  { %v135_v31 = vpop.xlane.xlu1 %134 }
 0x221   :  { %293 = vrcp.f32 %v135_v31 }
 0x224   :  { %v138_v32 = vpop.xlane.xlu1 %137 }
 0x225   :  { %295 = vrcp.f32 %v138_v32 }
 0x22b   :  { %v294_v33 = vpop.eup %293 }
 0x22c   :  { %v141_v35 = vmul.f32 %v294_v33, %v290_v24 }
 0x22e   :  { %v145_v36 = vmul.f32 %v144_v34, %v141_v35 }
 0x22f   :  { %v296_v37 = vpop.eup %295 }
 0x230   :  { %v142_v38 = vmul.f32 %v296_v37, %v292_v26  ;;  %v147_v39 = vpack.c.bf16 %v145_v36, %v145_v36 }
 0x232   :  { %279 = vmatmul.mubr.msk.bf16.vlgmr.msra.gmra.mrb[4].mxu0 %vm149_vm2, %v147_v39  ;;  %v146_v40 = vmul.f32 %v144_v34, %v142_v38 }
 0x234   :  { %v148_v41 = vpack.c.bf16 %v146_v40, %v146_v40 }
 0x236   :  { %281 = vmatmul.mubr.msk.bf16.vlgmr.msra.gmra.mrb[4].mxu1 %vm149_vm2, %v148_v41 }
 0x305   :  { %v194_v42 = vpop.f32.mrb[4].mxu0 }
 0x306   :  { %v195_v43 = vadd.f32 %v194_v42, %v380_v0  ;;  %v196_v44 = vpop.f32.mrb[5].mxu0 }
 0x307   :  { %v197_v45 = vadd.f32 %v196_v44, %v386_v2  ;;  %v198_v46 = vpop.f32.mrb[6].mxu0 }
 0x308   :  { %v199_v47 = vpop.f32.mrb[7].mxu0 }
 0x309   :  { %v255_v48 = vcombine.low %v195_v43, %v197_v45  ;;  %v244_v49 = vpop.f32.mrb[4].mxu1 }
 0x30a   :  { %v245_v50 = vadd.f32 %v244_v49, %v382_v1  ;;  %v246_v51 = vpop.f32.mrb[5].mxu1 }
 0x30b   :  { %259 = vst [vmem:[#allocation6] sm:$0xff] %v255_v48  ;;  %v247_v52 = vadd.f32 %v246_v51, %v390_v3  ;;  %v248_v53 = vpop.f32.mrb[6].mxu1 }
 0x30c   :  { %v249_v54 = vpop.f32.mrb[7].mxu1 }
 0x30d   :  { %v256_v55 = vcombine.low %v245_v50, %v247_v52 }
 0x30f   :  { %260 = vst [vmem:[#allocation6 + $0x8] sm:$0xff] %v256_v55 }
 0x310   :  { %330 = shalt.err (!%p327_p12)
}
 0x311   :  { %s331_s28 = scalar_lea.hbm %s428_s2, 256 }
 0x312   :  { %p332_p13 = scmp.ne.s32.totalorder %s428_s2, %s331_s28  ;;  %p335_p0 = scmp.lt.u32.totalorder %s331_s28, %s428_s2 }
 0x314   :  { %p337_p1 = pnand %p335_p0, %p332_p13 }
 0x316   :  { %340 = shalt.err (!%p337_p1)
}
 0x317   :  { %272 = dma.vmem_to_hbm [thread:$0]  %s267_s24, 256, %s428_s2, [#allocation5], %s346_s19, %s346_s19, %s347_s20  }
 0x318   :  { %343 = dma.done.wait [#allocation5], 256  }
 0x319   :  { %344 = vsyncadd [#allocation5], 4294967040 }
 0x31a   :  { %276 = vsyncpa [#allocation4], 1 }
 0x31b   :  { %277 = vsyncpa [#allocation5], 1 }

</bundles_post_ra>
